<compile_context>
chip_gen: v7x
topology: tpu7x:2x2x1
jax: 0.10.0
libtpu: 0.0.40
codegen_flags: <defaults>
</compile_context>

<pallas_src>
import math
import functools

import jax
import jax.numpy as jnp
from jax.experimental import pallas as pl
from jax.experimental.pallas import tpu as pltpu


# ---------------------------------------------------------------------------
# Scoped-VMEM budget: raise above the 16/32 MiB defaults, stay well inside
# v7x's 64 MiB physical VMEM (and ~3/4 of 128 MiB on v5e/v6e).
# ---------------------------------------------------------------------------
def _vmem_limit_bytes():
    try:
        cap = pltpu.get_tpu_info().vmem_capacity_bytes
        return int(min(100 * 1024 * 1024, (cap * 3) // 4))
    except Exception:                       # conservative, fits all generations
        return 48 * 1024 * 1024


_VMEM_LIMIT = _vmem_limit_bytes()


# ---------------------------------------------------------------------------
# Kernel 1: dense linear layer  y = x @ Wt + b   (Wt pre-transposed: (d_in, d_out))
# Grid = (d_out-tiles, row-tiles); rows innermost so the weight/bias column
# block stays resident across the inner sweep (fetched once per column tile).
# ---------------------------------------------------------------------------
def _linear_kernel(x_ref, wt_ref, b_ref, o_ref, *, compute_dtype):
    x = x_ref[...].astype(compute_dtype)
    w = wt_ref[...].astype(compute_dtype)
    acc = jnp.dot(x, w, preferred_element_type=jnp.float32)
    o_ref[...] = (acc + b_ref[...].astype(jnp.float32)).astype(o_ref.dtype)


def pallas_linear(x2d, wt, b, *, out_dtype=jnp.float32,
                  block_rows=512, block_cols=512):
    """x2d: (N, d_in); wt: (d_in, d_out) pre-transposed (storage = compute dtype);
    b: (d_out,)."""
    N, d_in = x2d.shape
    d_out = wt.shape[1]
    bm = min(block_rows, N)          # full extent or multiple of 8
    tn = min(block_cols, d_out)      # full extent or multiple of 128
    compute_dtype = wt.dtype
    kern = functools.partial(_linear_kernel, compute_dtype=compute_dtype)
    # TODO(synk): for very large d_model also tile d_in with a K-reduction
    #             accumulator (P3); weight rows kept resident here.
    # TODO(synk): mark the weight/bias specs pipeline_mode=pl.Buffered(1)
    #             (constant across the inner axis) once that path is required.
    return pl.pallas_call(
        kern,
        out_shape=jax.ShapeDtypeStruct((N, d_out), out_dtype),
        grid=(pl.cdiv(d_out, tn), pl.cdiv(N, bm)),     # cols outer, rows inner
        in_specs=[
            pl.BlockSpec((bm, d_in), lambda j, i: (i, 0)),
            pl.BlockSpec((d_in, tn), lambda j, i: (0, j)),
            pl.BlockSpec((1, tn), lambda j, i: (0, j)),
        ],
        out_specs=pl.BlockSpec((bm, tn), lambda j, i: (i, j)),
        compiler_params=pltpu.CompilerParams(
            dimension_semantics=("parallel", "parallel"),
            vmem_limit_bytes=_VMEM_LIMIT),
    )(x2d, wt, b.reshape(1, d_out))


# ---------------------------------------------------------------------------
# Kernel 2: scaled dot-product attention, one head per grid step.
# Grid = (B, Sq-tiles, H); H is innermost ("arbitrary") so per-head context
# tiles can be staged in a VMEM scratch and merged into one lane-dense
# (tq, D) store when the last head finishes.
# ---------------------------------------------------------------------------
def _attention_kernel(q_ref, k_ref, v_ref, *refs, inv_scale, compute_dtype,
                      need_weights):
    if need_weights:
        w_ref, ctx_ref, ctx_acc = refs
    else:
        ctx_ref, ctx_acc = refs
        w_ref = None

    h = pl.program_id(2)

    q = q_ref[0, 0].astype(jnp.float32)          # (tq, hd)
    k = k_ref[0, 0].astype(compute_dtype)        # (Sk, hd)
    v = v_ref[0, 0].astype(compute_dtype)        # (Sk, hd)

    # Fold 1/scale into q (tq*hd elems, not tq*Sk); contract over the last dim
    # of both operands (no explicit transpose before the MXU).
    qs = (q * inv_scale).astype(compute_dtype)
    scores = jax.lax.dot_general(
        qs, k, (((1,), (1,)), ((), ())),
        preferred_element_type=jnp.float32)      # (tq, Sk)

    # TODO(synk): optional attention mask (mask == 0 -> -1e9) not wired; the
    #             reference forward is exercised with mask=None.
    m = jnp.max(scores, axis=-1, keepdims=True)
    e = jnp.exp(scores - m)
    denom = jnp.sum(e, axis=-1, keepdims=True)
    attn = e * pl.reciprocal(denom, approx=True)  # EUP slot, frees VPU div

    # TODO(synk): nn.Dropout on attention weights is identity in eval mode.
    if need_weights:
        w_ref[0, 0] = attn.astype(w_ref.dtype)

    # Per-head context, staged in f32 scratch (dynamic leading-dim store).
    ctx_acc[h] = jnp.dot(attn.astype(compute_dtype), v,
                         preferred_element_type=jnp.float32)   # (tq, hd)

    # After the last head: merge heads in-register and do ONE lane-dense
    # (tq, D) store (D a multiple of 128 in realistic configs -> unmasked vst).
    @pl.when(h == pl.num_programs(2) - 1)
    def _():
        num_heads = ctx_acc.shape[0]
        merged = jnp.concatenate(
            [ctx_acc[i] for i in range(num_heads)], axis=-1)   # (tq, H*hd)
        ctx_ref[0] = merged.astype(ctx_ref.dtype)


def pallas_attention(qh, kh, vh, scale, *, need_weights=True,
                     compute_dtype=jnp.float32, ctx_dtype=None,
                     weights_dtype=jnp.float32, block_q=256):
    """qh/kh/vh: (B, H, S, hd).  Returns (attn (B,H,Sq,Sk) or None,
    head-merged ctx (B, Sq, H*hd))."""
    B, H, Sq, hd = qh.shape
    Sk = kh.shape[2]
    D = H * hd
    tq = min(block_q, Sq)            # use block_q=128 on v5e (4x128 MXU)
    if ctx_dtype is None:
        ctx_dtype = qh.dtype

    kern = functools.partial(_attention_kernel, inv_scale=1.0 / scale,
                             compute_dtype=compute_dtype,
                             need_weights=need_weights)

    q_spec = pl.BlockSpec((1, 1, tq, hd), lambda b, qi, h: (b, h, qi, 0))
    kv_spec = pl.BlockSpec((1, 1, Sk, hd), lambda b, qi, h: (b, h, 0, 0))
    ctx_spec = pl.BlockSpec((1, tq, D), lambda b, qi, h: (b, qi, 0))
    ctx_shape = jax.ShapeDtypeStruct((B, Sq, D), ctx_dtype)

    if need_weights:
        out_shape = (jax.ShapeDtypeStruct((B, H, Sq, Sk), weights_dtype),
                     ctx_shape)
        out_specs = (pl.BlockSpec((1, 1, tq, Sk),
                                  lambda b, qi, h: (b, h, qi, 0)),
                     ctx_spec)
    else:
        out_shape = ctx_shape
        out_specs = ctx_spec

    # TODO(synk): for very long Sk, add a kv grid axis with online-softmax
    #             accumulators (flash pattern) instead of full-length K/V blocks.
    out = pl.pallas_call(
        kern,
        out_shape=out_shape,
        grid=(B, pl.cdiv(Sq, tq), H),
        in_specs=[q_spec, kv_spec, kv_spec],
        out_specs=out_specs,
        scratch_shapes=[pltpu.VMEM((H, tq, hd), jnp.float32)],
        compiler_params=pltpu.CompilerParams(
            dimension_semantics=("parallel", "parallel", "arbitrary"),
            vmem_limit_bytes=_VMEM_LIMIT),
    )(qh, kh, vh)

    if need_weights:
        attn_weights, ctx = out
        return attn_weights, ctx
    return None, out


# ---------------------------------------------------------------------------
# Parameters (torch-convention masters + kernel-ready transposed/fused copies)
# ---------------------------------------------------------------------------
def init_mha_params(key, d_model):
    """Init mimicking nn.Linear default (uniform +-1/sqrt(fan_in)), torch
    layout (out, in), f32 masters."""
    bound = 1.0 / math.sqrt(d_model)
    keys = jax.random.split(key, 8)

    def u(k, shape):
        return jax.random.uniform(k, shape, jnp.float32, -bound, bound)

    return {
        "wq": u(keys[0], (d_model, d_model)), "bq": u(keys[1], (d_model,)),
        "wk": u(keys[2], (d_model, d_model)), "bk": u(keys[3], (d_model,)),
        "wv": u(keys[4], (d_model, d_model)), "bv": u(keys[5], (d_model,)),
        "wo": u(keys[6], (d_model, d_model)), "bo": u(keys[7], (d_model,)),
    }


def prepare_mha_params(params, dtype=jnp.float32):
    """Pre-transpose once (torch stores (out,in); kernels want (in,out)),
    fuse QKV, and store in the HBM/compute dtype (f32 or bf16)."""
    c = lambda a: a.astype(dtype)
    return {
        "wq_t": c(params["wq"].T), "bq": c(params["bq"]),
        "wk_t": c(params["wk"].T), "bk": c(params["bk"]),
        "wv_t": c(params["wv"].T), "bv": c(params["bv"]),
        "wo_t": c(params["wo"].T), "bo": c(params["bo"]),
        "w_qkv_t": c(jnp.concatenate([params["wq"], params["wk"],
                                      params["wv"]], axis=0).T),
        "b_qkv": c(jnp.concatenate([params["bq"], params["bk"],
                                    params["bv"]])),
    }


# ---------------------------------------------------------------------------
# MultiHeadAttention forward (wrapper glue in plain JAX)
# ---------------------------------------------------------------------------
def multi_head_attention(prep, query, key, value, num_heads, *,
                         need_weights=True, block_q=256,
                         block_rows=512, block_cols=512):
    """query/key/value: (seq, batch, d_model).  Returns (output, attn_weights)
    with attn_weights=None when need_weights=False."""
    Sq, B, D = query.shape
    Sk = key.shape[0]
    assert D % num_heads == 0
    head_dim = D // num_heads
    scale = math.sqrt(head_dim)
    inter_dtype = prep["wo_t"].dtype      # f32 or bf16 intermediates/weights

    def split_heads(x, S):
        # (S, B, D) -> (B, H, S, hd).
        # TODO(synk): could be folded into the projection's out_specs if the
        #             activation were laid out (B, S, D); with (S, B, D) input
        #             the required (ts, 1, D) block is sublane-unfriendly, so
        #             one XLA transpose is kept here.
        return x.reshape(S, B, num_heads, head_dim).transpose(1, 2, 0, 3)

    if (query is key) and (key is value):
        # Self-attention: fused QKV projection reads the activation once.
        qkv = pallas_linear(query.reshape(Sq * B, D), prep["w_qkv_t"],
                            prep["b_qkv"], out_dtype=inter_dtype,
                            block_rows=block_rows, block_cols=block_cols)
        qkvh = qkv.reshape(Sq, B, 3, num_heads, head_dim).transpose(2, 1, 3, 0, 4)
        qh, kh, vh = qkvh[0], qkvh[1], qkvh[2]
    else:
        q = pallas_linear(query.reshape(Sq * B, D), prep["wq_t"], prep["bq"],
                          out_dtype=inter_dtype, block_rows=block_rows,
                          block_cols=block_cols).reshape(Sq, B, D)
        k = pallas_linear(key.reshape(Sk * B, D), prep["wk_t"], prep["bk"],
                          out_dtype=inter_dtype, block_rows=block_rows,
                          block_cols=block_cols).reshape(Sk, B, D)
        v = pallas_linear(value.reshape(Sk * B, D), prep["wv_t"], prep["bv"],
                          out_dtype=inter_dtype, block_rows=block_rows,
                          block_cols=block_cols).reshape(Sk, B, D)
        qh, kh, vh = split_heads(q, Sq), split_heads(k, Sk), split_heads(v, Sk)

    attn_weights, ctx = pallas_attention(
        qh, kh, vh, scale, need_weights=need_weights,
        compute_dtype=inter_dtype, ctx_dtype=inter_dtype, block_q=block_q)

    # ctx is head-merged (B, Sq, D) -> output projection reads it directly.
    out = pallas_linear(ctx.reshape(B * Sq, D), prep["wo_t"], prep["bo"],
                        out_dtype=jnp.float32, block_rows=block_rows,
                        block_cols=block_cols)
    out = out.reshape(B, Sq, D).transpose(1, 0, 2)   # -> (Sq, B, D)
    return out, attn_weights


# ---------------------------------------------------------------------------
def _reference(params, query, key, value, num_heads):
    """Pure-JAX reference (f32 masters) for a sanity check."""
    Sq, B, D = query.shape
    hd = D // num_heads
    scale = math.sqrt(hd)
    lin = lambda x, w, b: x @ w.T + b
    q = lin(query, params["wq"], params["bq"])
    k = lin(key, params["wk"], params["bk"])
    v = lin(value, params["wv"], params["bv"])
    sh = lambda x: x.reshape(x.shape[0], B, num_heads, hd).transpose(1, 2, 0, 3)
    q, k, v = sh(q), sh(k), sh(v)
    scores = jnp.einsum("bhqd,bhkd->bhqk", q, k) / scale
    attn = jax.nn.softmax(scores, axis=-1)
    ctx = jnp.einsum("bhqk,bhkd->bhqd", attn, v)
    out = ctx.transpose(2, 0, 1, 3).reshape(Sq, B, D)
    out = lin(out, params["wo"], params["bo"])
    return out, attn


if __name__ == "__main__":
    seq_len, batch, d_model, num_heads = 8, 2, 32, 4

    root = jax.random.PRNGKey(0)
    k_params, k_q, k_k, k_v, k_x = jax.random.split(root, 5)
    params = init_mha_params(k_params, d_model)
    prep_f32 = prepare_mha_params(params, jnp.float32)
    prep_bf16 = prepare_mha_params(params, jnp.bfloat16)

    query = jax.random.normal(k_q, (seq_len, batch, d_model), jnp.float32)
    key_in = jax.random.normal(k_k, (seq_len, batch, d_model), jnp.float32)
    value = jax.random.normal(k_v, (seq_len, batch, d_model), jnp.float32)

    # --- cross-attention path (distinct q/k/v), f32 weights/intermediates ----
    out, attn = multi_head_attention(prep_f32, query, key_in, value, num_heads)
    out = jax.block_until_ready(out)
    attn = jax.block_until_ready(attn)

    ref_out, ref_attn = _reference(params, query, key_in, value, num_heads)
    assert out.shape == (seq_len, batch, d_model)
    assert attn.shape == (batch, num_heads, seq_len, seq_len)
    assert jnp.allclose(out, ref_out, atol=2e-3, rtol=2e-3)
    assert jnp.allclose(attn, ref_attn, atol=2e-3, rtol=2e-3)

    # --- self-attention (fused QKV), bf16 weights + intermediates -----------
    x = jax.random.normal(k_x, (seq_len, batch, d_model), jnp.float32)
    out2, attn2 = multi_head_attention(prep_bf16, x, x, x, num_heads)
    out2 = jax.block_until_ready(out2)
    attn2 = jax.block_until_ready(attn2)
    ref_out2, ref_attn2 = _reference(params, x, x, x, num_heads)
    assert jnp.allclose(out2, ref_out2, atol=5e-2, rtol=5e-2)
    assert jnp.allclose(attn2, ref_attn2, atol=5e-2, rtol=5e-2)

    # --- need_weights=False path (skips the (B,H,Sq,Sk) f32 HBM write) ------
    out3, w3 = multi_head_attention(prep_f32, x, x, x, num_heads,
                                    need_weights=False)
    out3 = jax.block_until_ready(out3)
    assert w3 is None
    assert jnp.allclose(out3, ref_out2, atol=2e-3, rtol=2e-3)

    print("KERNEL_OK")
</pallas_src>

<mosaic_0001>
module attributes {stable_mosaic.version = 11 : i64} {
  func.func @_linear_kernel(%arg0: i32, %arg1: i32, %arg2: memref<16x32xf32, #tpu.memory_space<vmem>>, %arg3: memref<32x32xf32, #tpu.memory_space<vmem>>, %arg4: memref<1x32xf32, #tpu.memory_space<vmem>>, %arg5: memref<16x32xf32, #tpu.memory_space<vmem>>) attributes {dimension_semantics = [#tpu.dimension_semantics<parallel>, #tpu.dimension_semantics<parallel>], iteration_bounds = array<i64: 1, 1>, scalar_prefetch = 0 : i64, scratch_operands = 0 : i64, tpu.core_type = #tpu.core_type<tc>, window_params = [{transform_indices = @transform_0, window_bounds = array<i64: 16, 32>}, {transform_indices = @transform_1, window_bounds = array<i64: 32, 32>}, {transform_indices = @transform_2, window_bounds = array<i64: 1, 32>}, {transform_indices = @transform_3, window_bounds = array<i64: 16, 32>}]} {
    %c0 = arith.constant 0 : index
    %c0_0 = arith.constant 0 : index
    %0 = vector.load %arg2[%c0, %c0_0] : memref<16x32xf32, #tpu.memory_space<vmem>>, vector<16x32xf32>
    %c0_1 = arith.constant 0 : index
    %c0_2 = arith.constant 0 : index
    %1 = vector.load %arg3[%c0_1, %c0_2] : memref<32x32xf32, #tpu.memory_space<vmem>>, vector<32x32xf32>
    %cst = arith.constant dense<0.000000e+00> : vector<16x32xf32>
    %2 = tpu.matmul %0, %1, %cst {dimension_numbers = #tpu.dot_dimension_numbers<[1], [0], [0], [1], [0, 0, 1, 1], [], []>} : vector<16x32xf32>, vector<32x32xf32>, vector<16x32xf32> -> vector<16x32xf32>
    %c0_3 = arith.constant 0 : index
    %c0_4 = arith.constant 0 : index
    %3 = vector.load %arg4[%c0_3, %c0_4] : memref<1x32xf32, #tpu.memory_space<vmem>>, vector<1x32xf32>
    %4 = vector.broadcast %3 : vector<1x32xf32> to vector<16x32xf32>
    %5 = arith.addf %2, %4 : vector<16x32xf32>
    %c0_5 = arith.constant 0 : index
    %c0_6 = arith.constant 0 : index
    %6 = vector.load %arg5[%c0_5, %c0_6] : memref<16x32xf32, #tpu.memory_space<vmem>>, vector<16x32xf32>
    tpu.vector_store %arg5[%c0_5, %c0_6], %5 {strides = array<i32>} : memref<16x32xf32, #tpu.memory_space<vmem>>, vector<16x32xf32>,
    return
  }
  func.func @transform_0(%arg0: i32, %arg1: i32) -> (i32, i32) {
    %c0_i32 = arith.constant 0 : i32
    %c0_i32_0 = arith.constant 0 : i32
    return %arg1, %c0_i32 : i32, i32
  }
  func.func @transform_1(%arg0: i32, %arg1: i32) -> (i32, i32) {
    %c0_i32 = arith.constant 0 : i32
    %c0_i32_0 = arith.constant 0 : i32
    return %c0_i32, %arg0 : i32, i32
  }
  func.func @transform_2(%arg0: i32, %arg1: i32) -> (i32, i32) {
    %c0_i32 = arith.constant 0 : i32
    %c0_i32_0 = arith.constant 0 : i32
    return %c0_i32, %arg0 : i32, i32
  }
  func.func @transform_3(%arg0: i32, %arg1: i32) -> (i32, i32) {
    %c0_i32 = arith.constant 0 : i32
    return %arg1, %arg0 : i32, i32
  }
}

</mosaic_0001>

<bundles_post_ra>
// kernel: tpu_custom_call.1
= control target key start
LH: loop header
LB: loop body
LE: loop exit
PB: predicated region body
PF: predicated region fallthrough
CT: control target
= control target key end

     0   :  { %8 = vsyncpa [#allocation3], 0  ;;  %s340_s0 = inlined_call_operand.hbm [shape: f32[16,32], index: 0, kind: input, shape index: {}]   ;;  %s341_s1 = inlined_call_operand.hbm [shape: f32[32,32], index: 1, kind: input, shape index: {}]   ;;  %s342_s2 = inlined_call_operand.vmem [shape: f32[1,32], index: 2, kind: input, shape index: {}]   ;;  %s343_s3 = inlined_call_operand.hbm [shape: f32[16,32], index: 3, kind: output, shape index: {}]  }
   0x1   :  { %9 = vsyncpa [#allocation6], 0 }
   0x2   :  { %10 = vsyncpa [#allocation4], 0  ;;  %s263_s12 = smov [#allocation2]   ;;  %s191_s16 = scalar_lea.hbm %s340_s0, 256 }
   0x3   :  { %s16_s13 = sshll.u32 %s263_s12, 4  ;;  %p192_p0 = scmp.ne.s32.totalorder %s340_s0, %s191_s16  ;;  %s17_s13 = int_to_ptr.vmem [resolvable:$true] %s16_s13 }
   0x4   :  { %p195_p1 = scmp.lt.u32.totalorder %s191_s16, %s340_s0 }
   0x6   :  { %p197_p2 = pnand %p195_p1, %p192_p0 }
   0x8   :  { %200 = shalt.err (!%p197_p2)
}
   0x9   :  { %s201_s21 = scalar_lea.vmem %s17_s13, 256  ;;  %p206_p4 = scmp.lt.s32.totalorder %s17_s13, %s17_s13 }
   0xa   :  { %p202_p3 = scmp.ne.s32.totalorder %s17_s13, %s201_s21  ;;  %p207_p5 = scmp.lt.s32.totalorder %s201_s21, %s201_s21 }
   0xc   :  { %p208_p6 = por %p207_p5, %p206_p4 }
   0xe   :  { %p209_p7 = pnand %p208_p6, %p202_p3 }
  0x10   :  { %212 = shalt.err (!%p209_p7)
}
  0x11   :  { %s264_s22 = smov 128   ;;  %s265_s23 = smov 8  }
  0x12   :  { %22 = dma.hbm_to_vmem [thread:$0]  %s340_s0, 256, %s17_s13, [#allocation3], %s264_s22, %s264_s22, %s265_s23  }
  0x13   :  { %s266_s26 = smov [#allocation5]   ;;  %s213_s30 = scalar_lea.hbm %s341_s1, 512 }
  0x14   :  { %s28_s27 = sshll.u32 %s266_s26, 4  ;;  %p214_p8 = scmp.ne.s32.totalorder %s341_s1, %s213_s30  ;;  %s29_s27 = int_to_ptr.vmem [resolvable:$true] %s28_s27 }
  0x15   :  { %p217_p9 = scmp.lt.u32.totalorder %s213_s30, %s341_s1 }
  0x17   :  { %p219_p10 = pnand %p217_p9, %p214_p8 }
  0x19   :  { %222 = shalt.err (!%p219_p10)
}
  0x1a   :  { %s223_s8 = scalar_lea.vmem %s29_s27, 512  ;;  %p228_p12 = scmp.lt.s32.totalorder %s29_s27, %s29_s27 }
  0x1b   :  { %p224_p11 = scmp.ne.s32.totalorder %s29_s27, %s223_s8  ;;  %p229_p13 = scmp.lt.s32.totalorder %s223_s8, %s223_s8 }
  0x1d   :  { %p230_p0 = por %p229_p13, %p228_p12 }
  0x1f   :  { %p231_p1 = pnand %p230_p0, %p224_p11 }
  0x21   :  { %234 = shalt.err (!%p231_p1)
}
  0x22   :  { %34 = dma.hbm_to_vmem [thread:$0]  %s341_s1, 512, %s29_s27, [#allocation6], %s264_s22, %s264_s22, %s265_s23  }
  0x23   :  { %257 = dma.done.wait [#allocation3], 256  }
  0x24   :  { %258 = vsyncadd [#allocation3], 4294967040 }
  0x25   :  { %259 = dma.done.wait [#allocation6], 512  }
  0x26   :  { %260 = vsyncadd [#allocation6], 4294966784  ;;  %vm56_vm0 = vcmask 261120   ;;  %v45_v0 = vld [vmem:[#allocation5] sm:$0xff]  ;;  %v46_v1 = vld [vmem:[#allocation5 + $0x8] sm:$0xff]  ;;  %s267_s11 = smov [#allocation7]  }
  0x27   :  { %v47_v2 = vld [vmem:[#allocation5 + $0x10] sm:$0xff]  ;;  %v178_v3 = vpack.c.bf16 %v46_v1, %v45_v0  ;;  %v48_v4 = vld [vmem:[#allocation5 + $0x18] sm:$0xff]  ;;  %s145_s12 = sshll.u32 %s267_s11, 4  ;;  %s146_s12 = int_to_ptr.vmem [resolvable:$true] %s145_s12 }
  0x28   :  { %v43_v5 = vld [vmem:[#allocation2] sm:$0xff]  ;;  %v182_v6 = vpack.c.bf16 %v48_v4, %v47_v2  ;;  %v44_v7 = vld [vmem:[#allocation2 + $0x8] sm:$0xff]  ;;  %s235_s13 = scalar_lea.vmem %s146_s12, 256  ;;  %p240_p3 = scmp.lt.s32.totalorder %s146_s12, %s146_s12 }
  0x29   :  { %175 = vmatprep.mubr.msk.f32.mxu0 %vm56_vm0, %v43_v5  ;;  %179 = vmatprep.subr.bf16.mxu0 %v178_v3  ;;  %v158_v8 = vld [vmem:[%s342_s2] ss:$0 sm:$0xff]  ;;  %p236_p2 = scmp.ne.s32.totalorder %s146_s12, %s235_s13  ;;  %p241_p4 = scmp.lt.s32.totalorder %s235_s13, %s235_s13 }
  0x2a   :  { %181 = vmatpush3.bf16.msra.mxu0 %v178_v3 }
  0x2b   :  { %183 = vmatprep.subr.bf16.mxu0 %v182_v6  ;;  %p242_p5 = por %p241_p4, %p240_p3 }
  0x2d   :  { %p243_p6 = pnand %p242_p5, %p236_p2 }
  0x2e   :  { %185 = vmatpush3.bf16.msra.mxu0 %v182_v6 }
  0x31   :  { %176 = vmatmul.mubr.msk.f32.vlgmr.msra.gmra.mrb[0].mxu0 %vm56_vm0, %v44_v7 }
 0x104   :  { %v177_v9 = vpop.f32.mrb[0].mxu0 }
 0x105   :  { %v135_v10 = vadd.f32 %v177_v9, %v158_v8  ;;  %v129_v11 = vpop.f32.mrb[1].mxu0 }
 0x106   :  { %v130_v12 = vadd.f32 %v158_v8, %v129_v11 }
 0x107   :  { %139 = vst.msk [vmem:[#allocation7 + $0x8] sm:$0xff] %vm56_vm0, %v135_v10 }
 0x108   :  { %138 = vst.msk [vmem:[#allocation7] sm:$0xff] %vm56_vm0, %v130_v12 }
 0x109   :  { %246 = shalt.err (!%p243_p6)
}
 0x10a   :  { %s247_s15 = scalar_lea.hbm %s343_s3, 256 }
 0x10b   :  { %p248_p7 = scmp.ne.s32.totalorder %s343_s3, %s247_s15  ;;  %p251_p8 = scmp.lt.u32.totalorder %s247_s15, %s343_s3 }
 0x10d   :  { %p253_p9 = pnand %p251_p8, %p248_p7 }
 0x10f   :  { %256 = shalt.err (!%p253_p9)
}
 0x110   :  { %151 = dma.vmem_to_hbm [thread:$0]  %s146_s12, 256, %s343_s3, [#allocation4], %s264_s22, %s264_s22, %s265_s23  }
 0x111   :  { %261 = dma.done.wait [#allocation4], 256  }
 0x112   :  { %262 = vsyncadd [#allocation4], 4294967040 }
 0x113   :  { %155 = vsyncpa [#allocation3], 1 }
 0x114   :  { %156 = vsyncpa [#allocation6], 1 }
 0x115   :  { %157 = vsyncpa [#allocation4], 1 }

</bundles_post_ra>
